<compile_context>
chip_gen: v7x
topology: tpu7x:2x2x1
jax: 0.10.0
libtpu: 0.0.40
codegen_flags: <defaults>
</compile_context>

<pallas_src>
import functools
import math

import jax
import jax.numpy as jnp
from jax.experimental import pallas as pl
from jax.experimental.pallas import tpu as pltpu


_INV_SQRT2 = 1.0 / math.sqrt(2.0)


def _round_up(n, m):
    return ((n + m - 1) // m) * m


def _choose_tn(in_f, out_f, w_bytes, budget=8 << 20):
    """Output-feature tile.  Keep the whole weight resident when small;
    otherwise tile N so one (in_f, TN) weight slab fits the budget.  Prefer
    256-multiples (v6e/v7x MXU is 2x256^2), fall back to 128-multiples."""
    if in_f * out_f * w_bytes <= budget:
        return out_f
    for step in (256, 128):
        if out_f % step != 0:
            continue
        tn = max(step, (budget // max(in_f * w_bytes, 1)) // step * step)
        tn = min(tn, out_f)
        while out_f % tn:
            tn -= step
        return max(tn, step)
    # Odd out_f that doesn't split on 128 lanes: keep it whole (full-dim block).
    return out_f


def _choose_tb(batch, in_f, tn, act_bytes, budget=8 << 20):
    """Batch tile: as large as the activation VMEM budget allows (x and out
    tiles, double buffered), multiple of 8 sublanes, capped by the batch."""
    per_row = 2 * (in_f + tn) * act_bytes
    tb = max(8, min(2048, (budget // max(per_row, 1)) // 8 * 8))
    return int(min(tb, _round_up(max(batch, 1), 8)))


def _resblock_kernel(x_ref, w_ref, b_ref, o_ref, *,
                     add_residual, n_tiled, tn, cast_dtype, f32_exact):
    # x tile: (TB, in_f); w tile: (in_f, TN); b tile: (1, TN); out: (TB, TN).
    x = x_ref[...]
    xc = x if cast_dtype is None else x.astype(cast_dtype)
    dot_kwargs = dict(preferred_element_type=jnp.float32)
    if f32_exact:
        # f32 x f32: force the accurate multi-pass MXU path (torch parity).
        dot_kwargs["precision"] = jax.lax.Precision.HIGHEST
    y = jnp.dot(xc, w_ref[...], **dot_kwargs)
    y = y + b_ref[...].astype(jnp.float32)
    # Exact GELU (torch nn.GELU default, approximate='none').
    y = 0.5 * y * (1.0 + jax.lax.erf(y * _INV_SQRT2))
    if add_residual:
        if n_tiled:
            # residual implies in_f == out_f; pick the matching column slab.
            start = pl.multiple_of(pl.program_id(0) * tn, tn)
            xr = x_ref[:, pl.ds(start, tn)]
        else:
            xr = x
        y = y + xr.astype(jnp.float32)
    o_ref[...] = y.astype(o_ref.dtype)


@functools.partial(jax.jit, static_argnames=("residual", "single_buffer_params"))
def resblock_forward(x2d, w, b, *, residual, single_buffer_params=True):
    """Fused Linear + GELU (+ residual) on a (B, in_f) slab -> (B, out_f)."""
    batch, in_f = x2d.shape
    in_f_w, out_f = w.shape
    assert in_f == in_f_w
    act_bytes = jnp.dtype(x2d.dtype).itemsize
    w_bytes = jnp.dtype(w.dtype).itemsize

    tn = _choose_tn(in_f, out_f, w_bytes)
    nbj = out_f // tn                       # _choose_tn guarantees tn | out_f
    tb = _choose_tb(batch, in_f, tn, act_bytes)
    nbi = pl.cdiv(batch, tb)                # ragged tail tile masked by Pallas

    resident_params = single_buffer_params and (nbj == 1)
    param_mode = {"pipeline_mode": pl.Buffered(1)} if resident_params else {}

    # Explicit scoped-VMEM limit from the chosen tiles (+30% / 2 MiB headroom).
    x_tile = tb * in_f * act_bytes
    o_tile = tb * tn * act_bytes
    w_tile = in_f * tn * w_bytes
    b_tile = tn * 4
    param_bufs = 1 if resident_params else 2
    vmem_need = 2 * (x_tile + o_tile) + param_bufs * (w_tile + b_tile)
    vmem_limit = int(min(max(int(vmem_need * 1.3) + (2 << 20), 32 << 20), 64 << 20))

    cast_dtype = w.dtype if w.dtype != x2d.dtype else None
    f32_exact = (w.dtype == jnp.float32) and (x2d.dtype == jnp.float32)

    kernel = functools.partial(
        _resblock_kernel,
        add_residual=residual, n_tiled=(nbj > 1), tn=tn,
        cast_dtype=cast_dtype, f32_exact=f32_exact,
    )

    # Grid: (N tiles, batch tiles) -- batch fastest, so a weight slab stays
    # resident across the whole batch sweep before moving to the next N slab.
    return pl.pallas_call(
        kernel,
        out_shape=jax.ShapeDtypeStruct((batch, out_f), x2d.dtype),
        grid=(nbj, nbi),
        in_specs=[
            pl.BlockSpec((tb, in_f), lambda j, i: (i, 0)),            # activations
            pl.BlockSpec((in_f, tn), lambda j, i: (0, j), **param_mode),  # weight
            pl.BlockSpec((1, tn), lambda j, i: (0, j), **param_mode),     # bias
        ],
        out_specs=pl.BlockSpec((tb, tn), lambda j, i: (i, j)),
        compiler_params=pltpu.CompilerParams(
            dimension_semantics=("parallel", "parallel"),
            vmem_limit_bytes=vmem_limit,
        ),
    )(x2d, w, b)


class ResBlockPallas:
    """JAX/Pallas reimplementation of ResBlock's forward pass."""

    def __init__(self, key, input_size, output_size=None, residual=True,
                 param_dtype=jnp.float32):
        if output_size is None:
            output_size = input_size
        if residual and input_size != output_size:
            residual = False  # same rule as the PyTorch module
        self.input_size = input_size
        self.output_size = output_size
        self.residual = residual

        # torch.nn.init.kaiming_uniform_ defaults (a=0, fan_in, leaky_relu)
        # => bound = sqrt(6 / fan_in); PyTorch weight layout is (out, in).
        bound = math.sqrt(6.0 / input_size)
        w_oi = jax.random.uniform(
            key, (output_size, input_size), jnp.float32, -bound, bound
        )
        # Stored (in, out); optionally bf16 for 2-4x MXU rate + half weight DMA.
        self.w = w_oi.T.astype(param_dtype)
        # Bias is zero-initialised; keep it f32 (tiny, preserves add precision).
        self.b = jnp.zeros((1, output_size), jnp.float32)

    def __call__(self, x):
        assert x.shape[-1] == self.input_size
        lead = x.shape[:-1]
        x2 = x.reshape(-1, self.input_size)
        # NOTE: distinct flattened batch sizes retrace/recompile (shapes are
        # static under jit) -- expected for serving-style workloads.
        try:
            y2 = resblock_forward(x2, self.w, self.b,
                                  residual=self.residual,
                                  single_buffer_params=True)
        except Exception:
            # Fallback only downgrades the Buffered(1) resident-parameter hint.
            y2 = resblock_forward(x2, self.w, self.b,
                                  residual=self.residual,
                                  single_buffer_params=False)
        return y2.reshape(*lead, self.output_size)

    # Pure-JAX reference for correctness checking (full f32).
    def reference(self, x):
        lead = x.shape[:-1]
        x2 = x.reshape(-1, self.input_size).astype(jnp.float32)
        w = self.w.astype(jnp.float32)
        y = jnp.dot(x2, w, precision=jax.lax.Precision.HIGHEST)
        y = y + self.b.astype(jnp.float32)
        y = 0.5 * y * (1.0 + jax.lax.erf(y * _INV_SQRT2))
        if self.residual:
            y = y + x2
        return y.reshape(*lead, self.output_size)


if __name__ == "__main__":
    key = jax.random.PRNGKey(0)
    k1, k2, kx = jax.random.split(key, 3)

    x = jax.random.normal(kx, (2, 4, 32), jnp.float32)

    # 1) Residual branch (output_size defaults to input_size), exact-f32 params.
    blk_res = ResBlockPallas(k1, input_size=32, residual=True)
    y_res = jax.block_until_ready(blk_res(x))
    assert y_res.shape == (2, 4, 32), y_res.shape
    err = float(jnp.max(jnp.abs(y_res - blk_res.reference(x))))
    assert jnp.allclose(y_res, blk_res.reference(x), atol=5e-4, rtol=5e-4), err

    # 2) Projection branch: dims differ -> residual auto-disabled (as in PyTorch).
    blk_proj = ResBlockPallas(k2, input_size=32, output_size=16, residual=True)
    y_proj = jax.block_until_ready(blk_proj(x))
    assert y_proj.shape == (2, 4, 16), y_proj.shape
    err = float(jnp.max(jnp.abs(y_proj - blk_proj.reference(x))))
    assert jnp.allclose(y_proj, blk_proj.reference(x), atol=5e-4, rtol=5e-4), err

    # 3) bf16-weight fast path (review item): same forward, relaxed tolerance.
    blk_bf16 = ResBlockPallas(k1, input_size=32, residual=True,
                              param_dtype=jnp.bfloat16)
    y_bf16 = jax.block_until_ready(blk_bf16(x))
    err = float(jnp.max(jnp.abs(y_bf16 - blk_bf16.reference(x))))
    assert jnp.allclose(y_bf16, blk_bf16.reference(x), atol=5e-2, rtol=5e-2), err

    print("KERNEL_OK")
</pallas_src>

<mosaic_0001>
module attributes {stable_mosaic.version = 11 : i64} {
  func.func @_resblock_kernel(%arg0: i32, %arg1: i32, %arg2: memref<8x32xf32, #tpu.memory_space<vmem>>, %arg3: memref<32x32xf32, #tpu.memory_space<vmem>>, %arg4: memref<1x32xf32, #tpu.memory_space<vmem>>, %arg5: memref<8x32xf32, #tpu.memory_space<vmem>>) attributes {dimension_semantics = [#tpu.dimension_semantics<parallel>, #tpu.dimension_semantics<parallel>], iteration_bounds = array<i64: 1, 1>, scalar_prefetch = 0 : i64, scratch_operands = 0 : i64, tpu.core_type = #tpu.core_type<tc>, window_params = [{transform_indices = @transform_0, window_bounds = array<i64: 8, 32>}, {pipeline_mode = #tpu.pipeline_mode<synchronous>, transform_indices = @transform_1, window_bounds = array<i64: 32, 32>}, {pipeline_mode = #tpu.pipeline_mode<synchronous>, transform_indices = @transform_2, window_bounds = array<i64: 1, 32>}, {transform_indices = @transform_3, window_bounds = array<i64: 8, 32>}]} {
    %c0 = arith.constant 0 : index
    %c0_0 = arith.constant 0 : index
    %0 = vector.load %arg2[%c0, %c0_0] : memref<8x32xf32, #tpu.memory_space<vmem>>, vector<8x32xf32>
    %c0_1 = arith.constant 0 : index
    %c0_2 = arith.constant 0 : index
    %1 = vector.load %arg3[%c0_1, %c0_2] : memref<32x32xf32, #tpu.memory_space<vmem>>, vector<32x32xf32>
    %cst = arith.constant dense<0.000000e+00> : vector<8x32xf32>
    %2 = tpu.matmul %0, %1, %cst {dimension_numbers = #tpu.dot_dimension_numbers<[1], [0], [0], [1], [0, 0, 1, 1], [], []>, precision = #tpu.contract_precision<fp32>} : vector<8x32xf32>, vector<32x32xf32>, vector<8x32xf32> -> vector<8x32xf32>
    %c0_3 = arith.constant 0 : index
    %c0_4 = arith.constant 0 : index
    %3 = vector.load %arg4[%c0_3, %c0_4] : memref<1x32xf32, #tpu.memory_space<vmem>>, vector<1x32xf32>
    %4 = vector.broadcast %3 : vector<1x32xf32> to vector<8x32xf32>
    %5 = arith.addf %2, %4 : vector<8x32xf32>
    %cst_5 = arith.constant 5.000000e-01 : f32
    %6 = vector.broadcast %cst_5 : f32 to vector<8x32xf32>
    %7 = arith.mulf %6, %5 : vector<8x32xf32>
    %cst_6 = arith.constant 0.707106769 : f32
    %8 = vector.broadcast %cst_6 : f32 to vector<8x32xf32>
    %9 = arith.mulf %5, %8 : vector<8x32xf32>
    %10 = math.erf %9 : vector<8x32xf32>
    %cst_7 = arith.constant 1.000000e+00 : f32
    %11 = vector.broadcast %cst_7 : f32 to vector<8x32xf32>
    %12 = arith.addf %11, %10 : vector<8x32xf32>
    %13 = arith.mulf %7, %12 : vector<8x32xf32>
    %14 = arith.addf %13, %0 : vector<8x32xf32>
    %c0_8 = arith.constant 0 : index
    %c0_9 = arith.constant 0 : index
    %15 = vector.load %arg5[%c0_8, %c0_9] : memref<8x32xf32, #tpu.memory_space<vmem>>, vector<8x32xf32>
    tpu.vector_store %arg5[%c0_8, %c0_9], %14 {strides = array<i32>} : memref<8x32xf32, #tpu.memory_space<vmem>>, vector<8x32xf32>,
    return
  }
  func.func @transform_0(%arg0: i32, %arg1: i32) -> (i32, i32) {
    %c0_i32 = arith.constant 0 : i32
    %c0_i32_0 = arith.constant 0 : i32
    return %arg1, %c0_i32 : i32, i32
  }
  func.func @transform_1(%arg0: i32, %arg1: i32) -> (i32, i32) {
    %c0_i32 = arith.constant 0 : i32
    %c0_i32_0 = arith.constant 0 : i32
    return %c0_i32, %arg0 : i32, i32
  }
  func.func @transform_2(%arg0: i32, %arg1: i32) -> (i32, i32) {
    %c0_i32 = arith.constant 0 : i32
    %c0_i32_0 = arith.constant 0 : i32
    return %c0_i32, %arg0 : i32, i32
  }
  func.func @transform_3(%arg0: i32, %arg1: i32) -> (i32, i32) {
    %c0_i32 = arith.constant 0 : i32
    return %arg1, %arg0 : i32, i32
  }
}

module attributes {stable_mosaic.version = 11 : i64} {
  func.func @_resblock_kernel(%arg0: i32, %arg1: i32, %arg2: memref<8x32xf32, #tpu.memory_space<vmem>>, %arg3: memref<32x32xf32, #tpu.memory_space<vmem>>, %arg4: memref<1x32xf32, #tpu.memory_space<vmem>>, %arg5: memref<8x32xf32, #tpu.memory_space<vmem>>) attributes {dimension_semantics = [#tpu.dimension_semantics<parallel>, #tpu.dimension_semantics<parallel>], iteration_bounds = array<i64: 1, 1>, scalar_prefetch = 0 : i64, scratch_operands = 0 : i64, tpu.core_type = #tpu.core_type<tc>, window_params = [{transform_indices = @transform_0, window_bounds = array<i64: 8, 32>}, {transform_indices = @transform_1, window_bounds = array<i64: 32, 32>}, {transform_indices = @transform_2, window_bounds = array<i64: 1, 32>}, {transform_indices = @transform_3, window_bounds = array<i64: 8, 32>}]} {
    %c0 = arith.constant 0 : index
    %c0_0 = arith.constant 0 : index
    %0 = vector.load %arg2[%c0, %c0_0] : memref<8x32xf32, #tpu.memory_space<vmem>>, vector<8x32xf32>
    %c0_1 = arith.constant 0 : index
    %c0_2 = arith.constant 0 : index
    %1 = vector.load %arg3[%c0_1, %c0_2] : memref<32x32xf32, #tpu.memory_space<vmem>>, vector<32x32xf32>
    %cst = arith.constant dense<0.000000e+00> : vector<8x32xf32>
    %2 = tpu.matmul %0, %1, %cst {dimension_numbers = #tpu.dot_dimension_numbers<[1], [0], [0], [1], [0, 0, 1, 1], [], []>, precision = #tpu.contract_precision<fp32>} : vector<8x32xf32>, vector<32x32xf32>, vector<8x32xf32> -> vector<8x32xf32>
    %c0_3 = arith.constant 0 : index
    %c0_4 = arith.constant 0 : index
    %3 = vector.load %arg4[%c0_3, %c0_4] : memref<1x32xf32, #tpu.memory_space<vmem>>, vector<1x32xf32>
    %4 = vector.broadcast %3 : vector<1x32xf32> to vector<8x32xf32>
    %5 = arith.addf %2, %4 : vector<8x32xf32>
    %cst_5 = arith.constant 5.000000e-01 : f32
    %6 = vector.broadcast %cst_5 : f32 to vector<8x32xf32>
    %7 = arith.mulf %6, %5 : vector<8x32xf32>
    %cst_6 = arith.constant 0.707106769 : f32
    %8 = vector.broadcast %cst_6 : f32 to vector<8x32xf32>
    %9 = arith.mulf %5, %8 : vector<8x32xf32>
    %10 = math.erf %9 : vector<8x32xf32>
    %cst_7 = arith.constant 1.000000e+00 : f32
    %11 = vector.broadcast %cst_7 : f32 to vector<8x32xf32>
    %12 = arith.addf %11, %10 : vector<8x32xf32>
    %13 = arith.mulf %7, %12 : vector<8x32xf32>
    %14 = arith.addf %13, %0 : vector<8x32xf32>
    %c0_8 = arith.constant 0 : index
    %c0_9 = arith.constant 0 : index
    %15 = vector.load %arg5[%c0_8, %c0_9] : memref<8x32xf32, #tpu.memory_space<vmem>>, vector<8x32xf32>
    tpu.vector_store %arg5[%c0_8, %c0_9], %14 {strides = array<i32>} : memref<8x32xf32, #tpu.memory_space<vmem>>, vector<8x32xf32>,
    return
  }
  func.func @transform_0(%arg0: i32, %arg1: i32) -> (i32, i32) {
    %c0_i32 = arith.constant 0 : i32
    %c0_i32_0 = arith.constant 0 : i32
    return %arg1, %c0_i32 : i32, i32
  }
  func.func @transform_1(%arg0: i32, %arg1: i32) -> (i32, i32) {
    %c0_i32 = arith.constant 0 : i32
    %c0_i32_0 = arith.constant 0 : i32
    return %c0_i32, %arg0 : i32, i32
  }
  func.func @transform_2(%arg0: i32, %arg1: i32) -> (i32, i32) {
    %c0_i32 = arith.constant 0 : i32
    %c0_i32_0 = arith.constant 0 : i32
    return %c0_i32, %arg0 : i32, i32
  }
  func.func @transform_3(%arg0: i32, %arg1: i32) -> (i32, i32) {
    %c0_i32 = arith.constant 0 : i32
    return %arg1, %arg0 : i32, i32
  }
}

</mosaic_0001>

<bundles_post_ra>
// kernel: resblock_forward.1
= control target key start
LH: loop header
LB: loop body
LE: loop exit
PB: predicated region body
PF: predicated region fallthrough
CT: control target
= control target key end

     0   :  { %8 = vsyncpa [#allocation3], 0  ;;  %s894_s0 = inlined_call_operand.hbm [shape: f32[8,32], index: 0, kind: input, shape index: {}]   ;;  %s895_s1 = inlined_call_operand.hbm [shape: f32[32,32], index: 1, kind: input, shape index: {}]   ;;  %s896_s2 = inlined_call_operand.vmem [shape: f32[1,32], index: 2, kind: input, shape index: {}]   ;;  %s897_s3 = inlined_call_operand.hbm [shape: f32[8,32], index: 3, kind: output, shape index: {}]  }
   0x1   :  { %9 = vsyncpa [#allocation6], 0 }
   0x2   :  { %10 = vsyncpa [#allocation4], 0  ;;  %s790_s12 = smov [#allocation2]   ;;  %s791_s14 = smov [#allocation5]  }
   0x3   :  { %s17_s13 = sshll.u32 %s790_s12, 4  ;;  %s26_s15 = sshll.u32 %s791_s14, 4  ;;  %s18_s13 = int_to_ptr.vmem [resolvable:$true] %s17_s13  ;;  %s818_s15 = int_to_ptr.vmem [resolvable:$true] %s26_s15 }
   0x4   :  { %s718_s18 = scalar_lea.hbm %s894_s0, 128 }
   0x5   :  { %p719_p0 = scmp.ne.s32.totalorder %s894_s0, %s718_s18  ;;  %p722_p1 = scmp.lt.u32.totalorder %s718_s18, %s894_s0 }
   0x7   :  { %p724_p2 = pnand %p722_p1, %p719_p0 }
   0x9   :  { %727 = shalt.err (!%p724_p2)
}
   0xa   :  { %s728_s23 = scalar_lea.vmem %s18_s13, 128  ;;  %p733_p4 = scmp.lt.s32.totalorder %s18_s13, %s18_s13 }
   0xb   :  { %p729_p3 = scmp.ne.s32.totalorder %s18_s13, %s728_s23  ;;  %p734_p5 = scmp.lt.s32.totalorder %s728_s23, %s728_s23 }
   0xd   :  { %p735_p6 = por %p734_p5, %p733_p4 }
   0xf   :  { %p736_p7 = pnand %p735_p6, %p729_p3 }
  0x11   :  { %739 = shalt.err (!%p736_p7)
}
  0x12   :  { %20 = dma.hbm_to_vmem [thread:$0]  %s894_s0, 128, %s18_s13, [#allocation3]  }
  0x13   :  { %s740_s28 = scalar_lea.hbm %s895_s1, 512 }
  0x14   :  { %p741_p8 = scmp.ne.s32.totalorder %s895_s1, %s740_s28  ;;  %p744_p9 = scmp.lt.u32.totalorder %s740_s28, %s895_s1 }
  0x16   :  { %p746_p10 = pnand %p744_p9, %p741_p8 }
  0x18   :  { %749 = shalt.err (!%p746_p10)
}
  0x19   :  { %s750_s6 = scalar_lea.vmem %s818_s15, 512  ;;  %p755_p12 = scmp.lt.s32.totalorder %s818_s15, %s818_s15 }
  0x1a   :  { %p751_p11 = scmp.ne.s32.totalorder %s818_s15, %s750_s6  ;;  %p756_p13 = scmp.lt.s32.totalorder %s750_s6, %s750_s6 }
  0x1c   :  { %p757_p0 = por %p756_p13, %p755_p12 }
  0x1e   :  { %p758_p1 = pnand %p757_p0, %p751_p11 }
  0x20   :  { %761 = shalt.err (!%p758_p1)
}
  0x21   :  { %s792_s0 = smov 128   ;;  %s793_s7 = smov 8  }
  0x22   :  { %32 = dma.hbm_to_vmem [thread:$0]  %s895_s1, 512, %s818_s15, [#allocation6], %s792_s0, %s792_s0, %s793_s7  }
  0x23   :  { %784 = dma.done.wait [#allocation3], 128  }
  0x24   :  { %785 = vsyncadd [#allocation3], 4294967168 }
  0x25   :  { %786 = dma.done.wait [#allocation6], 512  }
  0x26   :  { %787 = vsyncadd [#allocation6], 4294966784  ;;  %v794_v0 = vmov 0.0|0.0   ;;  %vm795_vm0 = vmmov 0   ;;  %v796_v1 = vmov 0.0   ;;  %vm53_vm1 = vcmask 261120  }
  0x27   :  { %662 = vmatprep.subr.bf16.mxu1 %v794_v0  ;;  %680 = vmatprep.subr.bf16.mxu0 %v794_v0  ;;  %v42_v2 = vld [vmem:[#allocation5] sm:$0xff]  ;;  %v43_v3 = vld [vmem:[#allocation5 + $0x8] sm:$0xff]  ;;  %v44_v4 = vld [vmem:[#allocation5 + $0x10] sm:$0xff]  ;;  %s797_s11 = smov [#allocation7]  }
  0x28   :  { %604 = vmatprep.mubr.msk.f32.mxu1 %vm795_vm0, %v796_v1  ;;  %637 = vmatprep.mubr.msk.f32.mxu0 %vm795_vm0, %v796_v1  ;;  %v58_v5 = vand.u32 4294901760, %v42_v2  ;;  %v61_v6 = vand.u32 4294901760, %v43_v3  ;;  %v45_v7 = vld [vmem:[#allocation5 + $0x18] sm:$0xff]  ;;  %v64_v8 = vand.u32 4294901760, %v44_v4  ;;  %s555_s12 = sshll.u32 %s797_s11, 4  ;;  %s556_s12 = int_to_ptr.vmem [resolvable:$true] %s555_s12 }
  0x29   :  { %v855_v9 = vld [vmem:[#allocation2] sm:$0xff]  ;;  %v67_v10 = vand.u32 4294901760, %v45_v7  ;;  %p767_p3 = scmp.lt.s32.totalorder %s556_s12, %s556_s12 }
  0x2a   :  { %v55_v11 = vsel %vm53_vm1, %v855_v9, 0  ;;  %v663_v12 = vpack.c.bf16 %v61_v6, %v58_v5  ;;  %v138_v13 = vsub.f32 %v42_v2, %v58_v5  ;;  %v145_v14 = vsub.f32 %v43_v3, %v61_v6  ;;  %v565_v41 = vld [vmem:[%s896_s2] ss:$0 sm:$0xff]  ;;  %s762_s2 = scalar_lea.vmem %s556_s12, 128 }
  0x2b   :  { %v152_v15 = vsub.f32 %v44_v4, %v64_v8  ;;  %v159_v16 = vsub.f32 %v45_v7, %v67_v10  ;;  %v126_v17 = vand.u32 4294901760, %v55_v11  ;;  %v666_v18 = vpack.c.bf16 %v67_v10, %v64_v8  ;;  %p763_p2 = scmp.ne.s32.totalorder %s556_s12, %s762_s2  ;;  %p768_p4 = scmp.lt.s32.totalorder %s762_s2, %s762_s2 }
  0x2c   :  { %664 = vmatpush3.bf16.msra.mxu1 %v663_v12  ;;  %682 = vmatpush3.bf16.msra.mxu0 %v663_v12  ;;  %v139_v19 = vand.u32 4294901760, %v138_v13  ;;  %v146_v20 = vand.u32 4294901760, %v145_v14  ;;  %v675_v39 = vpack.c.bf16 %v145_v14, %v138_v13 }
  0x2d   :  { %v153_v21 = vand.u32 4294901760, %v152_v15  ;;  %665 = vmatprep.subr.bf16.mxu1 %v794_v0  ;;  %683 = vmatprep.subr.bf16.mxu0 %v794_v0  ;;  %v127_v22 = vsub.f32 %v55_v11, %v126_v17  ;;  %v160_v23 = vand.u32 4294901760, %v159_v16  ;;  %v678_v40 = vpack.c.bf16 %v159_v16, %v152_v15  ;;  %p769_p5 = por %p768_p4, %p767_p3 }
  0x2e   :  { %v140_v24 = vsub.f32 %v138_v13, %v139_v19  ;;  %v147_v25 = vsub.f32 %v145_v14, %v146_v20  ;;  %v687_v31 = vpack.c.bf16 %v146_v20, %v139_v19 }
  0x2f   :  { %v154_v26 = vsub.f32 %v152_v15, %v153_v21  ;;  %v128_v27 = vand.u32 4294901760, %v127_v22  ;;  %v161_v28 = vsub.f32 %v159_v16, %v160_v23  ;;  %v690_v37 = vpack.c.bf16 %v160_v23, %v153_v21  ;;  %p770_p6 = pnand %p769_p5, %p763_p2 }
  0x30   :  { %667 = vmatpush3.bf16.msra.mxu1 %v666_v18  ;;  %685 = vmatpush3.bf16.msra.mxu0 %v666_v18  ;;  %v141_v29 = vand.u32 4294901760, %v140_v24  ;;  %v148_v30 = vand.u32 4294901760, %v147_v25 }
  0x31   :  { %v129_v32 = vsub.f32 %v127_v22, %v128_v27  ;;  %668 = vmatprep.subr.bf16.mxu1 %v794_v0  ;;  %686 = vmatprep.subr.bf16.mxu0 %v794_v0  ;;  %v155_v34 = vand.u32 4294901760, %v154_v26  ;;  %v162_v35 = vand.u32 4294901760, %v161_v28 }
  0x32   :  { %v669_v33 = vpack.c.bf16 %v148_v30, %v141_v29 }
  0x33   :  { %v130_v36 = vand.u32 4294901760, %v129_v32  ;;  %638 = vmatmul.mubr.f32.vlgmr.msra.gmra.mrb[0].mxu0 %v128_v27  ;;  %v672_v38 = vpack.c.bf16 %v162_v35, %v155_v34 }
  0x34   :  { %688 = vmatpush3.bf16.msra.mxu0 %v687_v31  ;;  %648 = vmatprep.mubr.msk.f32.mxu0 %vm795_vm0, %v796_v1 }
  0x35   :  { %605 = vmatmul.mubr.f32.vlgmr.msra.gmra.mrb[0].mxu1 %v130_v36  ;;  %689 = vmatprep.subr.bf16.mxu0 %v794_v0 }
  0x36   :  { %670 = vmatpush3.bf16.msra.mxu1 %v669_v33  ;;  %615 = vmatprep.mubr.msk.f32.mxu1 %vm795_vm0, %v796_v1 }
  0x37   :  { %671 = vmatprep.subr.bf16.mxu1 %v794_v0 }
  0x38   :  { %691 = vmatpush3.bf16.msra.mxu0 %v690_v37 }
  0x39   :  { %692 = vmatprep.subr.bf16.mxu0 %v794_v0 }
  0x3a   :  { %673 = vmatpush3.bf16.msra.mxu1 %v672_v38 }
  0x3b   :  { %674 = vmatprep.subr.bf16.mxu1 %v794_v0  ;;  %649 = vmatmul.mubr.f32.vlgmr.msra.gmra.mrb[0].mxu0 %v126_v17 }
  0x3c   :  { %694 = vmatpush3.bf16.msra.mxu0 %v663_v12  ;;  %659 = vmatprep.mubr.msk.f32.mxu0 %vm795_vm0, %v796_v1 }
  0x3d   :  { %616 = vmatmul.mubr.f32.vlgmr.msra.gmra.mrb[0].mxu1 %v126_v17  ;;  %695 = vmatprep.subr.bf16.mxu0 %v794_v0 }
  0x3e   :  { %676 = vmatpush3.bf16.msra.mxu1 %v675_v39  ;;  %626 = vmatprep.mubr.msk.f32.mxu1 %vm795_vm0, %v796_v1 }
  0x3f   :  { %677 = vmatprep.subr.bf16.mxu1 %v794_v0 }
  0x40   :  { %697 = vmatpush3.bf16.msra.mxu0 %v666_v18 }
  0x42   :  { %679 = vmatpush3.bf16.msra.mxu1 %v678_v40 }
  0x43   :  { %660 = vmatmul.mubr.f32.vlgmr.msra.gmra.mrb[0].mxu0 %v126_v17 }
  0x45   :  { %627 = vmatmul.mubr.f32.vlgmr.msra.gmra.mrb[0].mxu1 %v127_v22 }
 0x116   :  { %v538_v42 = vpop.f32.mrb[0].mxu0 }
 0x117   :  { %v661_v43 = vpop.f32.mrb[1].mxu0 }
 0x118   :  { %v303_v44 = vpop.f32.mrb[0].mxu1 }
 0x119   :  { %v698_v45 = vadd.f32 %v565_v41, %v303_v44  ;;  %v628_v46 = vpop.f32.mrb[1].mxu1 }
 0x11b   :  { %v699_v47 = vadd.f32 %v698_v45, %v538_v42 }
 0x11d   :  { %v543_v48 = vmul.f32 0.70710677, %v699_v47  ;;  %v542_v50 = vmul.f32 0.5, %v699_v47 }
 0x11f   :  { %716 = verf.f32 %v543_v48 }
 0x129   :  { %v717_v49 = vpop.eup %716 }
 0x12a   :  { %v545_v51 = vadd.f32 1.0, %v717_v49 }
 0x12c   :  { %v546_v52 = vmul.f32 %v545_v51, %v542_v50 }
 0x12e   :  { %v547_v53 = vadd.f32 %v546_v52, %v855_v9 }
 0x130   :  { %548 = vst.msk [vmem:[#allocation7] sm:$0xff] %vm53_vm1, %v547_v53 }
 0x131   :  { %773 = shalt.err (!%p770_p6)
}
 0x132   :  { %s774_s15 = scalar_lea.hbm %s897_s3, 128 }
 0x133   :  { %p775_p7 = scmp.ne.s32.totalorder %s897_s3, %s774_s15  ;;  %p778_p8 = scmp.lt.u32.totalorder %s774_s15, %s897_s3 }
 0x135   :  { %p780_p9 = pnand %p778_p8, %p775_p7 }
 0x137   :  { %783 = shalt.err (!%p780_p9)
}
 0x138   :  { %558 = dma.vmem_to_hbm [thread:$0]  %s556_s12, 128, %s897_s3, [#allocation4]  }
 0x139   :  { %788 = dma.done.wait [#allocation4], 128  }
 0x13a   :  { %789 = vsyncadd [#allocation4], 4294967168 }
 0x13b   :  { %562 = vsyncpa [#allocation3], 1 }
 0x13c   :  { %563 = vsyncpa [#allocation6], 1 }
 0x13d   :  { %564 = vsyncpa [#allocation4], 1 }

// kernel: resblock_forward.1
= control target key start
LH: loop header
LB: loop body
LE: loop exit
PB: predicated region body
PF: predicated region fallthrough
CT: control target
= control target key end

     0   :  { %8 = vsyncpa [#allocation3], 0  ;;  %s894_s0 = inlined_call_operand.hbm [shape: f32[8,32], index: 0, kind: input, shape index: {}]   ;;  %s895_s1 = inlined_call_operand.hbm [shape: f32[32,32], index: 1, kind: input, shape index: {}]   ;;  %s896_s2 = inlined_call_operand.vmem [shape: f32[1,32], index: 2, kind: input, shape index: {}]   ;;  %s897_s3 = inlined_call_operand.hbm [shape: f32[8,32], index: 3, kind: output, shape index: {}]  }
   0x1   :  { %9 = vsyncpa [#allocation6], 0 }
   0x2   :  { %10 = vsyncpa [#allocation4], 0  ;;  %s790_s12 = smov [#allocation2]   ;;  %s791_s14 = smov [#allocation5]  }
   0x3   :  { %s17_s13 = sshll.u32 %s790_s12, 4  ;;  %s26_s15 = sshll.u32 %s791_s14, 4  ;;  %s18_s13 = int_to_ptr.vmem [resolvable:$true] %s17_s13  ;;  %s818_s15 = int_to_ptr.vmem [resolvable:$true] %s26_s15 }
   0x4   :  { %s718_s18 = scalar_lea.hbm %s894_s0, 128 }
   0x5   :  { %p719_p0 = scmp.ne.s32.totalorder %s894_s0, %s718_s18  ;;  %p722_p1 = scmp.lt.u32.totalorder %s718_s18, %s894_s0 }
   0x7   :  { %p724_p2 = pnand %p722_p1, %p719_p0 }
   0x9   :  { %727 = shalt.err (!%p724_p2)
}
   0xa   :  { %s728_s23 = scalar_lea.vmem %s18_s13, 128  ;;  %p733_p4 = scmp.lt.s32.totalorder %s18_s13, %s18_s13 }
   0xb   :  { %p729_p3 = scmp.ne.s32.totalorder %s18_s13, %s728_s23  ;;  %p734_p5 = scmp.lt.s32.totalorder %s728_s23, %s728_s23 }
   0xd   :  { %p735_p6 = por %p734_p5, %p733_p4 }
   0xf   :  { %p736_p7 = pnand %p735_p6, %p729_p3 }
  0x11   :  { %739 = shalt.err (!%p736_p7)
}
  0x12   :  { %20 = dma.hbm_to_vmem [thread:$0]  %s894_s0, 128, %s18_s13, [#allocation3]  }
  0x13   :  { %s740_s28 = scalar_lea.hbm %s895_s1, 512 }
  0x14   :  { %p741_p8 = scmp.ne.s32.totalorder %s895_s1, %s740_s28  ;;  %p744_p9 = scmp.lt.u32.totalorder %s740_s28, %s895_s1 }
  0x16   :  { %p746_p10 = pnand %p744_p9, %p741_p8 }
  0x18   :  { %749 = shalt.err (!%p746_p10)
}
  0x19   :  { %s750_s6 = scalar_lea.vmem %s818_s15, 512  ;;  %p755_p12 = scmp.lt.s32.totalorder %s818_s15, %s818_s15 }
  0x1a   :  { %p751_p11 = scmp.ne.s32.totalorder %s818_s15, %s750_s6  ;;  %p756_p13 = scmp.lt.s32.totalorder %s750_s6, %s750_s6 }
  0x1c   :  { %p757_p0 = por %p756_p13, %p755_p12 }
  0x1e   :  { %p758_p1 = pnand %p757_p0, %p751_p11 }
  0x20   :  { %761 = shalt.err (!%p758_p1)
}
  0x21   :  { %s792_s0 = smov 128   ;;  %s793_s7 = smov 8  }
  0x22   :  { %32 = dma.hbm_to_vmem [thread:$0]  %s895_s1, 512, %s818_s15, [#allocation6], %s792_s0, %s792_s0, %s793_s7  }
  0x23   :  { %784 = dma.done.wait [#allocation3], 128  }
  0x24   :  { %785 = vsyncadd [#allocation3], 4294967168 }
  0x25   :  { %786 = dma.done.wait [#allocation6], 512  }
  0x26   :  { %787 = vsyncadd [#allocation6], 4294966784  ;;  %v794_v0 = vmov 0.0|0.0   ;;  %vm795_vm0 = vmmov 0   ;;  %v796_v1 = vmov 0.0   ;;  %vm53_vm1 = vcmask 261120  }
  0x27   :  { %662 = vmatprep.subr.bf16.mxu1 %v794_v0  ;;  %680 = vmatprep.subr.bf16.mxu0 %v794_v0  ;;  %v42_v2 = vld [vmem:[#allocation5] sm:$0xff]  ;;  %v43_v3 = vld [vmem:[#allocation5 + $0x8] sm:$0xff]  ;;  %v44_v4 = vld [vmem:[#allocation5 + $0x10] sm:$0xff]  ;;  %s797_s11 = smov [#allocation7]  }
  0x28   :  { %604 = vmatprep.mubr.msk.f32.mxu1 %vm795_vm0, %v796_v1  ;;  %637 = vmatprep.mubr.msk.f32.mxu0 %vm795_vm0, %v796_v1  ;;  %v58_v5 = vand.u32 4294901760, %v42_v2  ;;  %v61_v6 = vand.u32 4294901760, %v43_v3  ;;  %v45_v7 = vld [vmem:[#allocation5 + $0x18] sm:$0xff]  ;;  %v64_v8 = vand.u32 4294901760, %v44_v4  ;;  %s555_s12 = sshll.u32 %s797_s11, 4  ;;  %s556_s12 = int_to_ptr.vmem [resolvable:$true] %s555_s12 }
  0x29   :  { %v855_v9 = vld [vmem:[#allocation2] sm:$0xff]  ;;  %v67_v10 = vand.u32 4294901760, %v45_v7  ;;  %p767_p3 = scmp.lt.s32.totalorder %s556_s12, %s556_s12 }
  0x2a   :  { %v55_v11 = vsel %vm53_vm1, %v855_v9, 0  ;;  %v663_v12 = vpack.c.bf16 %v61_v6, %v58_v5  ;;  %v138_v13 = vsub.f32 %v42_v2, %v58_v5  ;;  %v145_v14 = vsub.f32 %v43_v3, %v61_v6  ;;  %v565_v41 = vld [vmem:[%s896_s2] ss:$0 sm:$0xff]  ;;  %s762_s2 = scalar_lea.vmem %s556_s12, 128 }
  0x2b   :  { %v152_v15 = vsub.f32 %v44_v4, %v64_v8  ;;  %v159_v16 = vsub.f32 %v45_v7, %v67_v10  ;;  %v126_v17 = vand.u32 4294901760, %v55_v11  ;;  %v666_v18 = vpack.c.bf16 %v67_v10, %v64_v8  ;;  %p763_p2 = scmp.ne.s32.totalorder %s556_s12, %s762_s2  ;;  %p768_p4 = scmp.lt.s32.totalorder %s762_s2, %s762_s2 }
  0x2c   :  { %664 = vmatpush3.bf16.msra.mxu1 %v663_v12  ;;  %682 = vmatpush3.bf16.msra.mxu0 %v663_v12  ;;  %v139_v19 = vand.u32 4294901760, %v138_v13  ;;  %v146_v20 = vand.u32 4294901760, %v145_v14  ;;  %v675_v39 = vpack.c.bf16 %v145_v14, %v138_v13 }
  0x2d   :  { %v153_v21 = vand.u32 4294901760, %v152_v15  ;;  %665 = vmatprep.subr.bf16.mxu1 %v794_v0  ;;  %683 = vmatprep.subr.bf16.mxu0 %v794_v0  ;;  %v127_v22 = vsub.f32 %v55_v11, %v126_v17  ;;  %v160_v23 = vand.u32 4294901760, %v159_v16  ;;  %v678_v40 = vpack.c.bf16 %v159_v16, %v152_v15  ;;  %p769_p5 = por %p768_p4, %p767_p3 }
  0x2e   :  { %v140_v24 = vsub.f32 %v138_v13, %v139_v19  ;;  %v147_v25 = vsub.f32 %v145_v14, %v146_v20  ;;  %v687_v31 = vpack.c.bf16 %v146_v20, %v139_v19 }
  0x2f   :  { %v154_v26 = vsub.f32 %v152_v15, %v153_v21  ;;  %v128_v27 = vand.u32 4294901760, %v127_v22  ;;  %v161_v28 = vsub.f32 %v159_v16, %v160_v23  ;;  %v690_v37 = vpack.c.bf16 %v160_v23, %v153_v21  ;;  %p770_p6 = pnand %p769_p5, %p763_p2 }
  0x30   :  { %667 = vmatpush3.bf16.msra.mxu1 %v666_v18  ;;  %685 = vmatpush3.bf16.msra.mxu0 %v666_v18  ;;  %v141_v29 = vand.u32 4294901760, %v140_v24  ;;  %v148_v30 = vand.u32 4294901760, %v147_v25 }
  0x31   :  { %v129_v32 = vsub.f32 %v127_v22, %v128_v27  ;;  %668 = vmatprep.subr.bf16.mxu1 %v794_v0  ;;  %686 = vmatprep.subr.bf16.mxu0 %v794_v0  ;;  %v155_v34 = vand.u32 4294901760, %v154_v26  ;;  %v162_v35 = vand.u32 4294901760, %v161_v28 }
  0x32   :  { %v669_v33 = vpack.c.bf16 %v148_v30, %v141_v29 }
  0x33   :  { %v130_v36 = vand.u32 4294901760, %v129_v32  ;;  %638 = vmatmul.mubr.f32.vlgmr.msra.gmra.mrb[0].mxu0 %v128_v27  ;;  %v672_v38 = vpack.c.bf16 %v162_v35, %v155_v34 }
  0x34   :  { %688 = vmatpush3.bf16.msra.mxu0 %v687_v31  ;;  %648 = vmatprep.mubr.msk.f32.mxu0 %vm795_vm0, %v796_v1 }
  0x35   :  { %605 = vmatmul.mubr.f32.vlgmr.msra.gmra.mrb[0].mxu1 %v130_v36  ;;  %689 = vmatprep.subr.bf16.mxu0 %v794_v0 }
  0x36   :  { %670 = vmatpush3.bf16.msra.mxu1 %v669_v33  ;;  %615 = vmatprep.mubr.msk.f32.mxu1 %vm795_vm0, %v796_v1 }
  0x37   :  { %671 = vmatprep.subr.bf16.mxu1 %v794_v0 }
  0x38   :  { %691 = vmatpush3.bf16.msra.mxu0 %v690_v37 }
  0x39   :  { %692 = vmatprep.subr.bf16.mxu0 %v794_v0 }
  0x3a   :  { %673 = vmatpush3.bf16.msra.mxu1 %v672_v38 }
  0x3b   :  { %674 = vmatprep.subr.bf16.mxu1 %v794_v0  ;;  %649 = vmatmul.mubr.f32.vlgmr.msra.gmra.mrb[0].mxu0 %v126_v17 }
  0x3c   :  { %694 = vmatpush3.bf16.msra.mxu0 %v663_v12  ;;  %659 = vmatprep.mubr.msk.f32.mxu0 %vm795_vm0, %v796_v1 }
  0x3d   :  { %616 = vmatmul.mubr.f32.vlgmr.msra.gmra.mrb[0].mxu1 %v126_v17  ;;  %695 = vmatprep.subr.bf16.mxu0 %v794_v0 }
  0x3e   :  { %676 = vmatpush3.bf16.msra.mxu1 %v675_v39  ;;  %626 = vmatprep.mubr.msk.f32.mxu1 %vm795_vm0, %v796_v1 }
  0x3f   :  { %677 = vmatprep.subr.bf16.mxu1 %v794_v0 }
  0x40   :  { %697 = vmatpush3.bf16.msra.mxu0 %v666_v18 }
  0x42   :  { %679 = vmatpush3.bf16.msra.mxu1 %v678_v40 }
  0x43   :  { %660 = vmatmul.mubr.f32.vlgmr.msra.gmra.mrb[0].mxu0 %v126_v17 }
  0x45   :  { %627 = vmatmul.mubr.f32.vlgmr.msra.gmra.mrb[0].mxu1 %v127_v22 }
 0x116   :  { %v538_v42 = vpop.f32.mrb[0].mxu0 }
 0x117   :  { %v661_v43 = vpop.f32.mrb[1].mxu0 }
 0x118   :  { %v303_v44 = vpop.f32.mrb[0].mxu1 }
 0x119   :  { %v698_v45 = vadd.f32 %v565_v41, %v303_v44  ;;  %v628_v46 = vpop.f32.mrb[1].mxu1 }
 0x11b   :  { %v699_v47 = vadd.f32 %v698_v45, %v538_v42 }
 0x11d   :  { %v543_v48 = vmul.f32 0.70710677, %v699_v47  ;;  %v542_v50 = vmul.f32 0.5, %v699_v47 }
 0x11f   :  { %716 = verf.f32 %v543_v48 }
 0x129   :  { %v717_v49 = vpop.eup %716 }
 0x12a   :  { %v545_v51 = vadd.f32 1.0, %v717_v49 }
 0x12c   :  { %v546_v52 = vmul.f32 %v545_v51, %v542_v50 }
 0x12e   :  { %v547_v53 = vadd.f32 %v546_v52, %v855_v9 }
 0x130   :  { %548 = vst.msk [vmem:[#allocation7] sm:$0xff] %vm53_vm1, %v547_v53 }
 0x131   :  { %773 = shalt.err (!%p770_p6)
}
 0x132   :  { %s774_s15 = scalar_lea.hbm %s897_s3, 128 }
 0x133   :  { %p775_p7 = scmp.ne.s32.totalorder %s897_s3, %s774_s15  ;;  %p778_p8 = scmp.lt.u32.totalorder %s774_s15, %s897_s3 }
 0x135   :  { %p780_p9 = pnand %p778_p8, %p775_p7 }
 0x137   :  { %783 = shalt.err (!%p780_p9)
}
 0x138   :  { %558 = dma.vmem_to_hbm [thread:$0]  %s556_s12, 128, %s897_s3, [#allocation4]  }
 0x139   :  { %788 = dma.done.wait [#allocation4], 128  }
 0x13a   :  { %789 = vsyncadd [#allocation4], 4294967168 }
 0x13b   :  { %562 = vsyncpa [#allocation3], 1 }
 0x13c   :  { %563 = vsyncpa [#allocation6], 1 }
 0x13d   :  { %564 = vsyncpa [#allocation4], 1 }

</bundles_post_ra>
